<compile_context>
chip_gen: v6e
topology: v6e:2x2x1
jax: 0.10.0
libtpu: 0.0.40
codegen_flags: <defaults>
</compile_context>

<pallas_src>
import functools

import jax
import jax.numpy as jnp
from jax import lax
from jax.experimental import pallas as pl
from jax.experimental.pallas import tpu as pltpu


def _round_up(x, m):
    return (x + m - 1) // m * m


@functools.lru_cache(maxsize=None)
def _roll_orientation():
    """Probe pltpu.roll lowering on this backend.

    Returns "np"  if pltpu.roll(x, s, axis) == jnp.roll(x, s, axis),
            "inv" if it equals jnp.roll(x, -s, axis),
            None  if roll is unsupported (-> shifted-slice fallback).
    """
    rows, cols = 256, 128
    st, sl = rows - 1, cols - 3     # mirrors the real kernel's shift pattern

    def probe(x_ref, o_ref):
        r = pltpu.roll(x_ref[...], shift=st, axis=0)
        o_ref[...] = pltpu.roll(r, shift=sl, axis=1)

    x = jnp.arange(rows * cols, dtype=jnp.float32).reshape(rows, cols)
    try:
        out = pl.pallas_call(
            probe, out_shape=jax.ShapeDtypeStruct((rows, cols), jnp.float32)
        )(x)
        out = jax.block_until_ready(out)
    except Exception:
        return None
    want_np = jnp.roll(jnp.roll(x, st, axis=0), sl, axis=1)
    want_inv = jnp.roll(jnp.roll(x, -st, axis=0), -sl, axis=1)
    if bool(jnp.array_equal(out, want_np)):
        return "np"
    if bool(jnp.array_equal(out, want_inv)):
        return "inv"
    return None


def _deepr_kernel(*refs, K, G, L_out, out_w, has_mask, roll_mode):
    # refs: x (TB,L,F), [mask (TB,L,1)], w (F,N), bias (1,out_w), out (TB,out_w)
    if has_mask:
        x_ref, mask_ref, w_ref, b_ref, out_ref = refs
    else:
        x_ref, w_ref, b_ref, out_ref = refs
    TB, L, F = x_ref.shape
    N = w_ref.shape[1]

    x = x_ref[...]
    if has_mask:
        x = x * mask_ref[...]                       # lane broadcast, VPU only
    x2d = x.reshape(TB * L, F)

    # One MXU matmul for all taps: y2d[b*L + t, k*G + h] = sum_f x[b,t,f] * w[h,f,k]
    y2d = jnp.dot(x2d, w_ref[...], preferred_element_type=jnp.float32)

    if roll_mode is not None:
        # conv[b,t,h] = sum_k y2d[b*L + t + k, k*G + h].  Cross-batch wrap only hits
        # rows with t >= L_out, which are masked to -inf before the time max.
        rows = TB * L
        acc2d = y2d
        for k in range(1, K):                        # K is small and static
            if roll_mode == "np":
                ts, ls = rows - k, (N - k * G) % N
            else:                                    # "inv"
                ts, ls = k, k * G
            s = pltpu.roll(y2d, shift=ts, axis=0)    # time shift (sublanes, XLU)
            if ls:
                s = pltpu.roll(s, shift=ls, axis=1)  # tap -> lane 0 (lanes, XLU)
            acc2d = acc2d + s
        acc = acc2d.reshape(TB, L, N)
        t_idx = lax.broadcasted_iota(jnp.int32, (TB, L, N), 1)
        acc = jnp.where(t_idx < L_out, acc, -jnp.inf)
        m = jnp.max(acc, axis=1)                     # (TB, N)
    else:
        # Fallback: 128-aligned per-tap lane groups + shifted sublane slices.
        y = y2d.reshape(TB, L, N)
        acc = y[:, 0:L_out, 0:G]
        for k in range(1, K):
            acc = acc + y[:, k:k + L_out, k * G:(k + 1) * G]
        m = jnp.max(acc, axis=1)                     # (TB, G)

    if m.shape[-1] != out_w:
        m = m[:, :out_w]
    # Bias + relu after the time max (exact rewrite).
    out_ref[...] = jnp.maximum(m + b_ref[...], 0.0).astype(out_ref.dtype)


def deepr_forward(x, weight, bias, mask=None, *, tb=None, compute_dtype=jnp.float32):
    """DeeprLayer.forward.  x: (B,L,F), weight: (H,F,K) (PyTorch Conv1d layout),
    bias: (H,), mask: optional (B,L).  Returns (B,H) float32."""
    B, L, F = x.shape
    H, F_w, K = weight.shape
    assert F_w == F, "weight feature dim mismatch"
    assert L >= K, "sequence length must be >= conv kernel size"
    L_out = L - K + 1

    roll_mode = _roll_orientation()

    # Tap lane packing: one 128-lane group when K*H <= 128 (and rolls available),
    # else 128-aligned per-tap groups.
    if roll_mode is not None and K * H <= 128:
        G = H
    else:
        G = _round_up(H, 128)
    N = _round_up(K * G, 128)
    out_w = _round_up(H, 128)

    # Adaptive batch tile: amortize per-step overhead / fill the MXU M dim, cap so
    # double-buffered x + y transients fit v7x VMEM, keep >= 2 grid steps (2 TCs).
    B_pad8 = _round_up(max(B, 1), 8)
    if tb is None:
        cap = 256
        n_steps = max(1, -(-B_pad8 // cap))
        if n_steps == 1 and B_pad8 > 8:
            n_steps = 2
        TB = _round_up(-(-B_pad8 // n_steps), 8)
    else:
        TB = _round_up(max(tb, 1), 8)
    B_pad = _round_up(B, TB)

    cdt = jnp.dtype(compute_dtype)
    isz = cdt.itemsize
    x_p = jnp.pad(x.astype(cdt), ((0, B_pad - B), (0, 0), (0, 0)))

    # w_cat[f, k*G + h] = weight[h, f, k]; zero-padded to (F, N).
    w_t = jnp.transpose(weight.astype(cdt), (1, 2, 0))          # (F, K, H)
    w_t = jnp.pad(w_t, ((0, 0), (0, 0), (0, G - H)))            # (F, K, G)
    w_cat = w_t.reshape(F, K * G)
    if N > K * G:
        w_cat = jnp.pad(w_cat, ((0, 0), (0, N - K * G)))
    b_pad = jnp.pad(bias.astype(jnp.float32), ((0, out_w - H),)).reshape(1, out_w)

    has_mask = mask is not None
    kernel = functools.partial(
        _deepr_kernel, K=K, G=G, L_out=L_out, out_w=out_w,
        has_mask=has_mask, roll_mode=roll_mode)

    in_specs = [pl.BlockSpec((TB, L, F), lambda b: (b, 0, 0))]          # x tile
    args = [x_p]
    if has_mask:
        mask_p = jnp.pad(mask.astype(cdt), ((0, B_pad - B), (0, 0)))[..., None]
        in_specs.append(pl.BlockSpec((TB, L, 1), lambda b: (b, 0, 0)))  # mask tile
        args.append(mask_p)
    in_specs += [
        pl.BlockSpec((F, N), lambda b: (0, 0)),                         # packed taps
        pl.BlockSpec((1, out_w), lambda b: (0, 0)),                     # bias
    ]
    args += [w_cat, b_pad]

    # VMEM budget: double-buffered x/mask/out + ~5 y-sized transients; clamp under
    # the v7x 64 MiB physical budget (v5e/v6e have 128 MiB physical).
    est = (2 * TB * L * F * isz + 2 * TB * L * isz + 2 * TB * out_w * 4
           + 2 * F * N * isz + 5 * TB * L * N * 4)
    vmem_limit = int(min(max(32 << 20, est), 48 << 20))

    out_padded = pl.pallas_call(
        kernel,
        out_shape=jax.ShapeDtypeStruct((B_pad, out_w), jnp.float32),
        grid_spec=pltpu.PrefetchScalarGridSpec(
            num_scalar_prefetch=0,
            grid=(B_pad // TB,),
            in_specs=in_specs,
            out_specs=pl.BlockSpec((TB, out_w), lambda b: (b, 0)),
        ),
        compiler_params=pltpu.CompilerParams(
            dimension_semantics=("parallel",),
            vmem_limit_bytes=vmem_limit,
        ),
        cost_estimate=pl.CostEstimate(
            flops=2 * B_pad * L * F * N,
            transcendentals=0,
            bytes_accessed=(B_pad * L * F * isz
                            + (B_pad * L * isz if has_mask else 0)
                            + F * N * isz + out_w * 4 + B_pad * out_w * 4),
        ),
    )(*args)

    return out_padded[:B, :H]


def deepr_reference(x, weight, bias, mask=None):
    """Pure-JAX reference matching the PyTorch forward."""
    if mask is not None:
        x = x * mask[..., None]
    H, F, K = weight.shape
    B, L, _ = x.shape
    L_out = L - K + 1
    acc = jnp.zeros((B, L_out, H), dtype=jnp.float32)
    for k in range(K):
        acc = acc + jnp.einsum("blf,hf->blh", x[:, k:k + L_out, :], weight[:, :, k],
                               precision=lax.Precision.HIGHEST)
    acc = acc + bias[None, None, :]
    acc = jnp.maximum(acc, 0.0)
    return jnp.max(acc, axis=1)


if __name__ == "__main__":
    # Module defaults: feature_size=100, window=1, hidden_size=3.
    B, L, F, H, window = 16, 16, 100, 3, 1
    K = 2 * window + 1

    key = jax.random.PRNGKey(0)
    kx, km, kw, kb = jax.random.split(key, 4)

    x = jax.random.normal(kx, (B, L, F), dtype=jnp.float32)
    mask = (jax.random.uniform(km, (B, L)) > 0.3).astype(jnp.float32)

    # Deterministic synthetic Conv1d parameters (PyTorch layout: (H, F, K)).
    fan_in = F * K
    bound = 1.0 / (fan_in ** 0.5)
    weight = jax.random.uniform(kw, (H, F, K), minval=-bound, maxval=bound,
                                dtype=jnp.float32)
    bias = jax.random.uniform(kb, (H,), minval=-bound, maxval=bound,
                              dtype=jnp.float32)

    out = jax.block_until_ready(deepr_forward(x, weight, bias, mask))
    ref = deepr_reference(x, weight, bias, mask)
    assert out.shape == (B, H)
    assert jnp.allclose(out, ref, atol=2e-4, rtol=2e-4), (out, ref)

    # Also exercise the dedicated mask=None kernel variant.
    out_nm = jax.block_until_ready(deepr_forward(x, weight, bias, None))
    ref_nm = deepr_reference(x, weight, bias, None)
    assert jnp.allclose(out_nm, ref_nm, atol=2e-4, rtol=2e-4), (out_nm, ref_nm)

    print("KERNEL_OK")
</pallas_src>

<mosaic_0001>
module attributes {stable_mosaic.version = 11 : i64} {
  func.func @probe(%arg0: memref<256x128xf32, #tpu.memory_space<vmem>>, %arg1: memref<256x128xf32, #tpu.memory_space<vmem>>) attributes {dimension_semantics = [], scalar_prefetch = 0 : i64, scratch_operands = 0 : i64, tpu.core_type = #tpu.core_type<tc>} {
    %c0 = arith.constant 0 : index
    %c0_0 = arith.constant 0 : index
    %0 = vector.load %arg0[%c0, %c0_0] : memref<256x128xf32, #tpu.memory_space<vmem>>, vector<256x128xf32>
    %c255_i32 = arith.constant 255 : i32
    %1 = tpu.dynamic_rotate %0 by %c255_i32 dim 0 : vector<256x128xf32>, i32 -> vector<256x128xf32>
    %c125_i32 = arith.constant 125 : i32
    %2 = tpu.dynamic_rotate %1 by %c125_i32 dim 1 : vector<256x128xf32>, i32 -> vector<256x128xf32>
    %c0_1 = arith.constant 0 : index
    %c0_2 = arith.constant 0 : index
    %3 = vector.load %arg1[%c0_1, %c0_2] : memref<256x128xf32, #tpu.memory_space<vmem>>, vector<256x128xf32>
    tpu.vector_store %arg1[%c0_1, %c0_2], %2 {strides = array<i32>} : memref<256x128xf32, #tpu.memory_space<vmem>>, vector<256x128xf32>,
    return
  }
}

module attributes {stable_mosaic.version = 11 : i64} {
  func.func @_deepr_kernel(%arg0: i32, %arg1: memref<8x16x100xf32, #tpu.memory_space<vmem>>, %arg2: memref<8x16x1xf32, #tpu.memory_space<vmem>>, %arg3: memref<100x384xf32, #tpu.memory_space<vmem>>, %arg4: memref<1x128xf32, #tpu.memory_space<vmem>>, %arg5: memref<8x128xf32, #tpu.memory_space<vmem>>) attributes {dimension_semantics = [#tpu.dimension_semantics<parallel>], iteration_bounds = array<i64: 2>, scalar_prefetch = 0 : i64, scratch_operands = 0 : i64, tpu.core_type = #tpu.core_type<tc>, window_params = [{transform_indices = @transform_0, window_bounds = array<i64: 8, 16, 100>}, {transform_indices = @transform_1, window_bounds = array<i64: 8, 16, 1>}, {pipeline_mode = #tpu.pipeline_mode<synchronous>, transform_indices = @transform_2, window_bounds = array<i64: 100, 384>}, {pipeline_mode = #tpu.pipeline_mode<synchronous>, transform_indices = @transform_3, window_bounds = array<i64: 1, 128>}, {transform_indices = @transform_4, window_bounds = array<i64: 8, 128>}]} {
    %c0 = arith.constant 0 : index
    %c0_0 = arith.constant 0 : index
    %c0_1 = arith.constant 0 : index
    %0 = vector.load %arg1[%c0, %c0_0, %c0_1] : memref<8x16x100xf32, #tpu.memory_space<vmem>>, vector<8x16x100xf32>
    %c0_2 = arith.constant 0 : index
    %c0_3 = arith.constant 0 : index
    %c0_4 = arith.constant 0 : index
    %1 = vector.load %arg2[%c0_2, %c0_3, %c0_4] : memref<8x16x1xf32, #tpu.memory_space<vmem>>, vector<8x16x1xf32>
    %2 = vector.broadcast %1 : vector<8x16x1xf32> to vector<8x16x100xf32>
    %3 = arith.mulf %0, %2 : vector<8x16x100xf32>
    %4 = vector.shape_cast %3 : vector<8x16x100xf32> to vector<128x100xf32>
    %c0_5 = arith.constant 0 : index
    %c0_6 = arith.constant 0 : index
    %5 = vector.load %arg3[%c0_5, %c0_6] : memref<100x384xf32, #tpu.memory_space<vmem>>, vector<100x384xf32>
    %cst = arith.constant dense<0.000000e+00> : vector<128x384xf32>
    %6 = tpu.matmul %4, %5, %cst {dimension_numbers = #tpu.dot_dimension_numbers<[1], [0], [0], [1], [0, 0, 1, 1], [], []>} : vector<128x100xf32>, vector<100x384xf32>, vector<128x384xf32> -> vector<128x384xf32>
    %7 = vector.shape_cast %6 : vector<128x384xf32> to vector<8x16x384xf32>
    %8 = vector.extract_strided_slice %7 {offsets = [0, 0, 0], sizes = [8, 14, 128], strides = [1, 1, 1]} : vector<8x16x384xf32> to vector<8x14x128xf32>
    %9 = vector.extract_strided_slice %7 {offsets = [0, 1, 128], sizes = [8, 14, 128], strides = [1, 1, 1]} : vector<8x16x384xf32> to vector<8x14x128xf32>
    %10 = arith.addf %8, %9 : vector<8x14x128xf32>
    %11 = vector.extract_strided_slice %7 {offsets = [0, 2, 256], sizes = [8, 14, 128], strides = [1, 1, 1]} : vector<8x16x384xf32> to vector<8x14x128xf32>
    %12 = arith.addf %10, %11 : vector<8x14x128xf32>
    %cst_7 = arith.constant dense<0xFF800000> : vector<8x128xf32>
    %13 = vector.multi_reduction <maximumf>, %12, %cst_7 [1] : vector<8x14x128xf32> to vector<8x128xf32>
    %c0_8 = arith.constant 0 : index
    %c0_9 = arith.constant 0 : index
    %14 = vector.load %arg4[%c0_8, %c0_9] : memref<1x128xf32, #tpu.memory_space<vmem>>, vector<1x128xf32>
    %15 = vector.broadcast %14 : vector<1x128xf32> to vector<8x128xf32>
    %16 = arith.addf %13, %15 : vector<8x128xf32>
    %cst_10 = arith.constant 0.000000e+00 : f32
    %17 = vector.broadcast %cst_10 : f32 to vector<8x128xf32>
    %18 = arith.maximumf %16, %17 : vector<8x128xf32>
    %c0_11 = arith.constant 0 : index
    %c0_12 = arith.constant 0 : index
    %19 = vector.load %arg5[%c0_11, %c0_12] : memref<8x128xf32, #tpu.memory_space<vmem>>, vector<8x128xf32>
    tpu.vector_store %arg5[%c0_11, %c0_12], %18 {strides = array<i32>} : memref<8x128xf32, #tpu.memory_space<vmem>>, vector<8x128xf32>,
    return
  }
  func.func @transform_0(%arg0: i32) -> (i32, i32, i32) {
    %c0_i32 = arith.constant 0 : i32
    %c0_i32_0 = arith.constant 0 : i32
    %c0_i32_1 = arith.constant 0 : i32
    return %arg0, %c0_i32, %c0_i32_0 : i32, i32, i32
  }
  func.func @transform_1(%arg0: i32) -> (i32, i32, i32) {
    %c0_i32 = arith.constant 0 : i32
    %c0_i32_0 = arith.constant 0 : i32
    %c0_i32_1 = arith.constant 0 : i32
    return %arg0, %c0_i32, %c0_i32_0 : i32, i32, i32
  }
  func.func @transform_2(%arg0: i32) -> (i32, i32) {
    %c0_i32 = arith.constant 0 : i32
    %c0_i32_0 = arith.constant 0 : i32
    %c0_i32_1 = arith.constant 0 : i32
    return %c0_i32, %c0_i32_0 : i32, i32
  }
  func.func @transform_3(%arg0: i32) -> (i32, i32) {
    %c0_i32 = arith.constant 0 : i32
    %c0_i32_0 = arith.constant 0 : i32
    %c0_i32_1 = arith.constant 0 : i32
    return %c0_i32, %c0_i32_0 : i32, i32
  }
  func.func @transform_4(%arg0: i32) -> (i32, i32) {
    %c0_i32 = arith.constant 0 : i32
    %c0_i32_0 = arith.constant 0 : i32
    return %arg0, %c0_i32 : i32, i32
  }
}

</mosaic_0001>

<bundles_post_ra>
// kernel: tpu_custom_call.1
= control target key start
LH: loop header
LB: loop body
LE: loop exit
PB: predicated region body
PF: predicated region fallthrough
CT: control target
= control target key end

     0   :  { %6 = vsyncpa [#allocation3], 0  ;;  %s417_s0 = inlined_call_operand.hbm [shape: f32[256,128], index: 0, kind: input, shape index: {}]   ;;  %s418_s1 = inlined_call_operand.hbm [shape: f32[256,128], index: 1, kind: output, shape index: {}]  }
   0x1   :  { %7 = vsyncpa [#allocation4], 0  ;;  %s284_s6 = smov [#allocation2]  }
   0x2   :  { %s13_s7 = sshll.u32 %s284_s6, 4  ;;  %s14_s7 = int_to_ptr.vmem [resolvable:$true] %s13_s7 }
   0x3   :  { %s248_s8 = scalar_lea.vmem %s14_s7, 4096  ;;  %p253_p1 = scmp.lt.s32.totalorder %s14_s7, %s14_s7 }
   0x4   :  { %p249_p0 = scmp.ne.s32.totalorder %s14_s7, %s248_s8  ;;  %p254_p2 = scmp.lt.s32.totalorder %s248_s8, %s248_s8 }
   0x6   :  { %p255_p3 = por %p254_p2, %p253_p1 }
   0x8   :  { %p256_p4 = pnand %p255_p3, %p249_p0 }
   0xa   :  { %259 = shalt.err (!%p256_p4)
}
   0xb   :  { %s285_s9 = smov 128   ;;  %s286_s10 = smov 8  }
   0xc   :  { %19 = dma.hbm_to_vmem [thread:$0]  %s417_s0, 4096, %s14_s7, [#allocation3], %s285_s9, %s285_s9, %s286_s10  }
   0xd   :  { %280 = dma.done.wait [#allocation3], 4096  }
   0xe   :  { %281 = vsyncadd [#allocation3], 4294963200  ;;  %v87_v0 = vlaneseq  ;;  %v25_v2 = vld [vmem:[#allocation2 + $0x10] sm:$0xff]  ;;  %v26_v3 = vld [vmem:[#allocation2 + $0x18] sm:$0xff]  ;;  %s287_s0 = smov 125   ;;  %s288_s13 = smov [#allocation5]  }
   0xf   :  { %v308_v4 = vld [vmem:[#allocation2] sm:$0xff]  ;;  %v57_v5 = vrot.slane %v25_v2, 1  ;;  %v58_v6 = vrot.slane %v26_v3, 1  ;;  %v24_v7 = vld [vmem:[#allocation2 + $0x8] sm:$0xff]  ;;  %v29_v13 = vld [vmem:[#allocation2 + $0x30] sm:$0xff]  ;;  %s223_s14 = sshll.u32 %s288_s13, 4  ;;  %s224_s14 = int_to_ptr.vmem [resolvable:$true] %s223_s14 }
  0x10   :  { %v305_v1 = vshrl.u32 %v87_v0, 7  ;;  %v55_v8 = vrot.slane %v308_v4, 1  ;;  %v27_v9 = vld [vmem:[#allocation2 + $0x20] sm:$0xff]  ;;  %v56_v10 = vrot.slane %v24_v7, 1  ;;  %v28_v12 = vld [vmem:[#allocation2 + $0x28] sm:$0xff]  ;;  %v61_v18 = vrot.slane %v29_v13, 1  ;;  %p265_p6 = scmp.lt.s32.totalorder %s224_s14, %s224_s14 }
  0x11   :  { %v59_v11 = vrot.slane %v27_v9, 1  ;;  %v60_v17 = vrot.slane %v28_v12, 1  ;;  %v30_v20 = vld [vmem:[#allocation2 + $0x38] sm:$0xff]  ;;  %v31_v21 = vld [vmem:[#allocation2 + $0x40] sm:$0xff]  ;;  %v32_v26 = vld [vmem:[#allocation2 + $0x48] sm:$0xff]  ;;  %s260_s15 = scalar_lea.vmem %s224_s14, 4096 }
  0x12   :  { %vm89_vm0 = vcmp.lt.s32.totalorder %v305_v1, 7  ;;  %v62_v23 = vrot.slane %v30_v20, 1  ;;  %v63_v24 = vrot.slane %v31_v21, 1  ;;  %v33_v27 = vld [vmem:[#allocation2 + $0x50] sm:$0xff]  ;;  %v64_v29 = vrot.slane %v32_v26, 1  ;;  %v34_v32 = vld [vmem:[#allocation2 + $0x58] sm:$0xff]  ;;  %p261_p5 = scmp.ne.s32.totalorder %s224_s14, %s260_s15  ;;  %p266_p7 = scmp.lt.s32.totalorder %s260_s15, %s260_s15 }
  0x13   :  { %v118_v14 = vsel %vm89_vm0, %v57_v5, %v58_v6  ;;  %v120_v15 = vsel %vm89_vm0, %v55_v8, %v56_v10  ;;  %v117_v16 = vsel %vm89_vm0, %v58_v6, %v59_v11  ;;  %v119_v19 = vsel %vm89_vm0, %v56_v10, %v57_v5  ;;  %v35_v33 = vld [vmem:[#allocation2 + $0x60] sm:$0xff]  ;;  %v36_v38 = vld [vmem:[#allocation2 + $0x68] sm:$0xff]  ;;  %v37_v39 = vld [vmem:[#allocation2 + $0x70] sm:$0xff] }
  0x14   :  { %126 = vrot.lane.b32.xlu1 %v118_v14, %s287_s0  ;;  %122 = vrot.lane.b32.xlu0 %v120_v15, %s287_s0  ;;  %v115_v22 = vsel %vm89_vm0, %v60_v17, %v61_v18  ;;  %v116_v25 = vsel %vm89_vm0, %v59_v11, %v60_v17  ;;  %v113_v28 = vsel %vm89_vm0, %v62_v23, %v63_v24  ;;  %v65_v30 = vrot.slane %v33_v27, 1  ;;  %v38_v44 = vld [vmem:[#allocation2 + $0x78] sm:$0xff]  ;;  %v39_v45 = vld [vmem:[#allocation2 + $0x80] sm:$0xff]  ;;  %v40_v50 = vld [vmem:[#allocation2 + $0x88] sm:$0xff]  ;;  %p267_p8 = por %p266_p7, %p265_p6 }
  0x15   :  { %v114_v31 = vsel %vm89_vm0, %v61_v18, %v62_v23  ;;  %v66_v35 = vrot.slane %v34_v32, 1  ;;  %v67_v36 = vrot.slane %v35_v33, 1  ;;  %v112_v37 = vsel %vm89_vm0, %v63_v24, %v64_v29  ;;  %v41_v51 = vld [vmem:[#allocation2 + $0x90] sm:$0xff]  ;;  %v42_v56 = vld [vmem:[#allocation2 + $0x98] sm:$0xff]  ;;  %v43_v57 = vld [vmem:[#allocation2 + $0xa0] sm:$0xff] }
  0x16   :  { %v111_v34 = vsel %vm89_vm0, %v64_v29, %v65_v30  ;;  %v68_v41 = vrot.slane %v36_v38, 1  ;;  %v69_v42 = vrot.slane %v37_v39, 1  ;;  %v70_v47 = vrot.slane %v38_v44, 1  ;;  %v44_v62 = vld [vmem:[#allocation2 + $0xa8] sm:$0xff]  ;;  %v45_v63 = vld [vmem:[#allocation2 + $0xb0] sm:$0xff]  ;;  %v46_v6 = vld [vmem:[#allocation2 + $0xb8] sm:$0xff]  ;;  %p268_p9 = pnand %p267_p8, %p261_p5 }
  0x17   :  { %v109_v40 = vsel %vm89_vm0, %v66_v35, %v67_v36  ;;  %v110_v43 = vsel %vm89_vm0, %v65_v30, %v66_v35  ;;  %v71_v48 = vrot.slane %v39_v45, 1  ;;  %v72_v53 = vrot.slane %v40_v50, 1  ;;  %v47_v7 = vld [vmem:[#allocation2 + $0xc0] sm:$0xff]  ;;  %v48_v13 = vld [vmem:[#allocation2 + $0xc8] sm:$0xff]  ;;  %v49_v14 = vld [vmem:[#allocation2 + $0xd0] sm:$0xff] }
  0x18   :  { %128 = vrot.lane.b32.xlu1 %v117_v16, %s287_s0  ;;  %124 = vrot.lane.b32.xlu0 %v119_v19, %s287_s0  ;;  %v107_v46 = vsel %vm89_vm0, %v68_v41, %v69_v42  ;;  %v108_v49 = vsel %vm89_vm0, %v67_v36, %v68_v41  ;;  %v73_v54 = vrot.slane %v41_v51, 1  ;;  %v106_v55 = vsel %vm89_vm0, %v69_v42, %v70_v47  ;;  %v50_v19 = vld [vmem:[#allocation2 + $0xd8] sm:$0xff]  ;;  %v51_v20 = vld [vmem:[#allocation2 + $0xe0] sm:$0xff]  ;;  %v53_v26 = vld [vmem:[#allocation2 + $0xf0] sm:$0xff] }
  0x19   :  { %v105_v52 = vsel %vm89_vm0, %v70_v47, %v71_v48  ;;  %v74_v59 = vrot.slane %v42_v56, 1  ;;  %v75_v60 = vrot.slane %v43_v57, 1  ;;  %v104_v61 = vsel %vm89_vm0, %v71_v48, %v72_v53 }
  0x1a   :  { %v103_v58 = vsel %vm89_vm0, %v72_v53, %v73_v54  ;;  %v76_v2 = vrot.slane %v44_v62, 1  ;;  %v77_v3 = vrot.slane %v45_v63, 1  ;;  %v78_v10 = vrot.slane %v46_v6, 1 }
  0x1b   :  { %v101_v0 = vsel %vm89_vm0, %v74_v59, %v75_v60  ;;  %v102_v5 = vsel %vm89_vm0, %v73_v54, %v74_v59  ;;  %v79_v11 = vrot.slane %v47_v7, 1  ;;  %v80_v16 = vrot.slane %v48_v13, 1 }
  0x1c   :  { %132 = vrot.lane.b32.xlu1 %v115_v22, %s287_s0  ;;  %130 = vrot.lane.b32.xlu0 %v116_v25, %s287_s0  ;;  %v99_v9 = vsel %vm89_vm0, %v76_v2, %v77_v3  ;;  %v100_v12 = vsel %vm89_vm0, %v75_v60, %v76_v2  ;;  %v81_v17 = vrot.slane %v49_v14, 1  ;;  %v98_v18 = vsel %vm89_vm0, %v77_v3, %v78_v10  ;;  %v52_v25 = vld [vmem:[#allocation2 + $0xe8] sm:$0xff] }
  0x1d   :  { %v97_v15 = vsel %vm89_vm0, %v78_v10, %v79_v11  ;;  %v82_v22 = vrot.slane %v50_v19, 1  ;;  %v83_v23 = vrot.slane %v51_v20, 1  ;;  %v96_v24 = vsel %vm89_vm0, %v79_v11, %v80_v16 }
  0x1e   :  { %v95_v21 = vsel %vm89_vm0, %v80_v16, %v81_v17  ;;  %v85_v29 = vrot.slane %v53_v26, 1 }
  0x1f   :  { %v93_v27 = vsel %vm89_vm0, %v82_v22, %v83_v23  ;;  %v94_v30 = vsel %vm89_vm0, %v81_v17, %v82_v22 }
  0x20   :  { %136 = vrot.lane.b32.xlu1 %v113_v28, %s287_s0  ;;  %134 = vrot.lane.b32.xlu0 %v114_v31, %s287_s0  ;;  %v84_v28 = vrot.slane %v52_v25, 1  ;;  %v54_v31 = vld [vmem:[#allocation2 + $0xf8] sm:$0xff] }
  0x21   :  { %v86_v33 = vrot.slane %v54_v31, 1 }
  0x22   :  { %v91_v32 = vsel %vm89_vm0, %v84_v28, %v85_v29 }
  0x23   :  { %v121_v35 = vsel %vm89_vm0, %v86_v33, %v55_v8  ;;  %v90_v36 = vsel %vm89_vm0, %v85_v29, %v86_v33 }
  0x24   :  { %140 = vrot.lane.b32.xlu1 %v111_v34, %s287_s0  ;;  %138 = vrot.lane.b32.xlu0 %v112_v37, %s287_s0  ;;  %v92_v34 = vsel %vm89_vm0, %v83_v23, %v84_v28 }
  0x28   :  { %144 = vrot.lane.b32.xlu1 %v109_v40, %s287_s0  ;;  %142 = vrot.lane.b32.xlu0 %v110_v43, %s287_s0 }
  0x2c   :  { %148 = vrot.lane.b32.xlu1 %v107_v46, %s287_s0  ;;  %146 = vrot.lane.b32.xlu0 %v108_v49, %s287_s0 }
  0x30   :  { %152 = vrot.lane.b32.xlu1 %v105_v52, %s287_s0  ;;  %150 = vrot.lane.b32.xlu0 %v106_v55, %s287_s0 }
  0x34   :  { %156 = vrot.lane.b32.xlu1 %v103_v58, %s287_s0  ;;  %154 = vrot.lane.b32.xlu0 %v104_v61, %s287_s0 }
  0x38   :  { %160 = vrot.lane.b32.xlu1 %v101_v0, %s287_s0  ;;  %158 = vrot.lane.b32.xlu0 %v102_v5, %s287_s0 }
  0x3c   :  { %164 = vrot.lane.b32.xlu1 %v99_v9, %s287_s0  ;;  %162 = vrot.lane.b32.xlu0 %v100_v12, %s287_s0 }
  0x40   :  { %168 = vrot.lane.b32.xlu1 %v97_v15, %s287_s0  ;;  %166 = vrot.lane.b32.xlu0 %v98_v18, %s287_s0 }
  0x44   :  { %172 = vrot.lane.b32.xlu1 %v95_v21, %s287_s0  ;;  %170 = vrot.lane.b32.xlu0 %v96_v24, %s287_s0 }
  0x48   :  { %176 = vrot.lane.b32.xlu1 %v93_v27, %s287_s0  ;;  %174 = vrot.lane.b32.xlu0 %v94_v30, %s287_s0 }
  0x4c   :  { %180 = vrot.lane.b32.xlu1 %v91_v32, %s287_s0  ;;  %178 = vrot.lane.b32.xlu0 %v92_v34, %s287_s0 }
  0x50   :  { %184 = vrot.lane.b32.xlu1 %v121_v35, %s287_s0  ;;  %182 = vrot.lane.b32.xlu0 %v90_v36, %s287_s0 }
  0x86   :  { %v127_v37 = vpop.permute.xlu1 %126  ;;  %v123_v38 = vpop.permute.xlu0 %122 }
  0x87   :  { %188 = vst [vmem:[#allocation5 + $0x10] sm:$0xff] %v127_v37  ;;  %186 = vst [vmem:[#allocation5] sm:$0xff] %v123_v38 }
  0x8a   :  { %v129_v39 = vpop.permute.xlu1 %128  ;;  %v125_v40 = vpop.permute.xlu0 %124 }
  0x8b   :  { %189 = vst [vmem:[#allocation5 + $0x18] sm:$0xff] %v129_v39  ;;  %187 = vst [vmem:[#allocation5 + $0x8] sm:$0xff] %v125_v40 }
  0x8e   :  { %v133_v41 = vpop.permute.xlu1 %132  ;;  %v131_v4 = vpop.permute.xlu0 %130 }
  0x8f   :  { %191 = vst [vmem:[#allocation5 + $0x28] sm:$0xff] %v133_v41  ;;  %190 = vst [vmem:[#allocation5 + $0x20] sm:$0xff] %v131_v4 }
  0x92   :  { %v137_v8 = vpop.permute.xlu1 %136  ;;  %v135_v1 = vpop.permute.xlu0 %134 }
  0x93   :  { %193 = vst [vmem:[#allocation5 + $0x38] sm:$0xff] %v137_v8  ;;  %192 = vst [vmem:[#allocation5 + $0x30] sm:$0xff] %v135_v1 }
  0x96   :  { %v141_v42 = vpop.permute.xlu1 %140  ;;  %v139_v43 = vpop.permute.xlu0 %138 }
  0x97   :  { %195 = vst [vmem:[#allocation5 + $0x48] sm:$0xff] %v141_v42  ;;  %194 = vst [vmem:[#allocation5 + $0x40] sm:$0xff] %v139_v43 }
  0x9a   :  { %v145_v44 = vpop.permute.xlu1 %144  ;;  %v143_v45 = vpop.permute.xlu0 %142 }
  0x9b   :  { %197 = vst [vmem:[#allocation5 + $0x58] sm:$0xff] %v145_v44  ;;  %196 = vst [vmem:[#allocation5 + $0x50] sm:$0xff] %v143_v45 }
  0x9e   :  { %v149_v46 = vpop.permute.xlu1 %148  ;;  %v147_v47 = vpop.permute.xlu0 %146 }
  0x9f   :  { %199 = vst [vmem:[#allocation5 + $0x68] sm:$0xff] %v149_v46  ;;  %198 = vst [vmem:[#allocation5 + $0x60] sm:$0xff] %v147_v47 }
  0xa2   :  { %v153_v48 = vpop.permute.xlu1 %152  ;;  %v151_v49 = vpop.permute.xlu0 %150 }
  0xa3   :  { %201 = vst [vmem:[#allocation5 + $0x78] sm:$0xff] %v153_v48  ;;  %200 = vst [vmem:[#allocation5 + $0x70] sm:$0xff] %v151_v49 }
  0xa6   :  { %v157_v50 = vpop.permute.xlu1 %156  ;;  %v155_v51 = vpop.permute.xlu0 %154 }
  0xa7   :  { %203 = vst [vmem:[#allocation5 + $0x88] sm:$0xff] %v157_v50  ;;  %202 = vst [vmem:[#allocation5 + $0x80] sm:$0xff] %v155_v51 }
  0xaa   :  { %v161_v52 = vpop.permute.xlu1 %160  ;;  %v159_v53 = vpop.permute.xlu0 %158 }
  0xab   :  { %205 = vst [vmem:[#allocation5 + $0x98] sm:$0xff] %v161_v52  ;;  %204 = vst [vmem:[#allocation5 + $0x90] sm:$0xff] %v159_v53 }
  0xae   :  { %v165_v54 = vpop.permute.xlu1 %164  ;;  %v163_v55 = vpop.permute.xlu0 %162 }
  0xaf   :  { %207 = vst [vmem:[#allocation5 + $0xa8] sm:$0xff] %v165_v54  ;;  %206 = vst [vmem:[#allocation5 + $0xa0] sm:$0xff] %v163_v55 }
  0xb2   :  { %v169_v56 = vpop.permute.xlu1 %168  ;;  %v167_v57 = vpop.permute.xlu0 %166 }
  0xb3   :  { %209 = vst [vmem:[#allocation5 + $0xb8] sm:$0xff] %v169_v56  ;;  %208 = vst [vmem:[#allocation5 + $0xb0] sm:$0xff] %v167_v57 }
  0xb6   :  { %v173_v58 = vpop.permute.xlu1 %172  ;;  %v171_v59 = vpop.permute.xlu0 %170 }
  0xb7   :  { %211 = vst [vmem:[#allocation5 + $0xc8] sm:$0xff] %v173_v58  ;;  %210 = vst [vmem:[#allocation5 + $0xc0] sm:$0xff] %v171_v59 }
  0xba   :  { %v177_v60 = vpop.permute.xlu1 %176  ;;  %v175_v61 = vpop.permute.xlu0 %174 }
  0xbb   :  { %213 = vst [vmem:[#allocation5 + $0xd8] sm:$0xff] %v177_v60  ;;  %212 = vst [vmem:[#allocation5 + $0xd0] sm:$0xff] %v175_v61 }
  0xbe   :  { %v181_v62 = vpop.permute.xlu1 %180  ;;  %v179_v63 = vpop.permute.xlu0 %178 }
  0xbf   :  { %215 = vst [vmem:[#allocation5 + $0xe8] sm:$0xff] %v181_v62  ;;  %214 = vst [vmem:[#allocation5 + $0xe0] sm:$0xff] %v179_v63 }
  0xc2   :  { %v185_v0 = vpop.permute.xlu1 %184  ;;  %v183_v2 = vpop.permute.xlu0 %182 }
  0xc3   :  { %217 = vst [vmem:[#allocation5 + $0xf8] sm:$0xff] %v185_v0  ;;  %216 = vst [vmem:[#allocation5 + $0xf0] sm:$0xff] %v183_v2 }
  0xc4   :  { %271 = shalt.err (!%p268_p9)
}
  0xc5   :  { %229 = dma.vmem_to_hbm [thread:$0]  %s224_s14, 4096, %s418_s1, [#allocation4], %s285_s9, %s285_s9, %s286_s10  }
  0xc6   :  { %282 = dma.done.wait [#allocation4], 4096  }
  0xc7   :  { %283 = vsyncadd [#allocation4], 4294963200 }
  0xc8   :  { %233 = vsyncpa [#allocation3], 1 }
  0xc9   :  { %234 = vsyncpa [#allocation4], 1 }

// kernel: tpu_custom_call.1
= control target key start
LH: loop header
LB: loop body
LE: loop exit
PB: predicated region body
PF: predicated region fallthrough
CT: control target
= control target key end

     0   :  { %9 = vsyncpa [#allocation3], 0  ;;  %s1695_s0 = inlined_call_operand.vmem [shape: f32[16,16,100], index: 0, kind: input, shape index: {}]   ;;  %s1696_s1 = inlined_call_operand.vmem [shape: f32[16,16,1], index: 1, kind: input, shape index: {}]   ;;  %s1697_s2 = inlined_call_operand.hbm [shape: f32[100,384], index: 2, kind: input, shape index: {}]   ;;  %s1698_s3 = inlined_call_operand.vmem [shape: f32[1,128], index: 3, kind: input, shape index: {}]   ;;  %s1699_s4 = inlined_call_operand.hbm [shape: f32[16,128], index: 4, kind: output, shape index: {}]  }
   0x1   :  { %10 = vsyncpa [#allocation4], 0 }
   0x2   :  { %12 = vsyncpa [#allocation4 + $0x1], 0  ;;  %s1447_s15 = smov 0   ;;  %s1449_s16 = smov 0  }
   0x3   :  { %s1451_s17 = smov 0   ;;  %s1453_s18 = smov 0  }
   0x4 LB: > { %s1468_s19 = sadd.s32 4294967295, %s1414_s18   ;;  %s1134_s20 = sadd.s32 4294967294, %s1414_s18   ;;  %s1414_s18 = sphi %s1453_s18, %s1707_s18   ;;  %s1410_s17 = sphi %s1451_s17, %s1706_s17   ;;  %s1406_s16 = sphi %s1449_s16, %s1705_s16   ;;  %s1402_s15 = sphi %s1447_s15, %s1704_s15  }
   0x5   : > { %s1472_s21 = sadd.s32 1, %s1414_s18   ;;  %s119_s22 = sadd.s32 1, %s1410_s17 }
   0x6   : > { %s116_s23 = ssub.s32 %s1414_s18, %s1472_s21  ;;  %p129_p0 = scmp.ne.s32.totalorder %s1410_s17, %s1406_s16 }
   0x7   : > { %p117_p1 = scmp.eq.s32.totalorder %s116_s23, 0  ;;  %p130_p2 = scmp.eq.s32.totalorder %s1468_s19, 1 }
   0x8   : > { %p135_p3 = scmp.ne.s32.totalorder %s1406_s16, %s1402_s15  ;;  %p136_p4 = scmp.eq.s32.totalorder %s1134_s20, 1 }
   0x9   : > { %s1483_s24 = scalar_select %p117_p1, %s1410_s17, %s119_s22  }
   0xa   : > { %p1485_p5 = por %p130_p2, %p129_p0  ;;  %p1489_p6 = por %p136_p4, %p135_p3 }
   0xb   : > { %p1135_p7 = scmp.ge.s32.totalorder %s1414_s18, 1  ;;  %p143_p8 = scmp.lt.s32.totalorder %s1414_s18, 3 }
   0xc   : > { %s1701_s26 = scalar_select %p1489_p6, 1, 0 }
   0xd   : > { %p1282_p9 = scmp.eq.s32.totalorder %s1468_s19, 0  ;;  %p1496_p10 = pnand %p1135_p7, %p143_p8 }
   0xe   : > { %s1416_s28 = smov [#allocation2]  }
   0xf   : > { %s155_s29 = sshll.u32 %s1416_s28, 4  ;;  %p1274_p11 = pneg %p1496_p10  ;;  %s156_s29 = int_to_ptr.vmem [resolvable:$true] %s155_s29 }
  0x10   : > { %s1335_s30 = scalar_lea.vmem %s156_s29, 4992  ;;  %p1343_p3 = scmp.lt.s32.totalorder %s156_s29, %s156_s29 }
  0x11   : > { %p1275_p12 = pnand %p1282_p9, %p1274_p11  ;;  %p1336_p0 = scmp.ne.s32.totalorder %s156_s29, %s1335_s30 }
  0x12   : > { %p1344_p4 = scmp.lt.s32.totalorder %s1335_s30, %s1335_s30 }
  0x13   : > { %p1326_p13 = pneg %p1275_p12 }
  0x14   : > { %p1345_p6 = por %p1344_p4, %p1343_p3 }
  0x15   : > { %p1338_p1 = pnand %p1336_p0, %p1326_p13 }
  0x17   : > { %p1339_p2 = pneg %p1338_p1 }
  0x19   : > { %p1346_p7 = pnand %p1345_p6, %p1339_p2 }
  0x1b   : > { %1349 = shalt.err (!%p1346_p7)
}
  0x1c   : > { %s1417_s5 = smov 384   ;;  %s1418_s6 = smov 24  }
  0x1d   : > { %1277 = dma.hbm_to_vmem [thread:$0]  (!%p1275_p12), %s1697_s2, 4992, %s156_s29, [#allocation3], %s1417_s5, %s1417_s5, %s1418_s6  }
  0x1e   : > { %194 = sbr.rel (%p1496_p10) target bundleno = 465 (0x1d1), region = 36 }
  0x23   : > { %1393 = dma.done.wait (%p1282_p9), [#allocation3], 4992  }
  0x24   : > { %1395 = vsyncadd (%p1282_p9), [#allocation3], 4294962304  ;;  %s1141_s9 = sshll.u32 %s1468_s19, 3  ;;  %v1419_v0 = vmov 0   ;;  %v1420_v1 = vmov 0.0   ;;  %vm457_vm0 = vcmask 1043456  }
  0x25   : > { %1323 = vset.pattern.permute.xlu1 %v1419_v0  ;;  %1322 = vset.pattern.permute.xlu0 %v1419_v0  ;;  %p228_p6 = scmp.lt.s32.totalorder %s1141_s9, 15  ;;  %v406_v6 = vld [vmem:[#allocation2 + $0x128] sm:$0xf]  ;;  %v405_v7 = vld [vmem:[#allocation2 + $0x120] sm:$0xf]  ;;  %v403_v10 = vld [vmem:[#allocation2 + $0x110] sm:$0xff] }
  0x26   : > { %531 = vmatprep.mubr.f32.mxu0 %v1420_v1  ;;  %1147 = vmatprep.subr.msk.mxu0 %vm457_vm0, %v406_v6  ;;  %v402_v11 = vld [vmem:[#allocation2 + $0x108] sm:$0xff]  ;;  %v407_v12 = vld [vmem:[#allocation2 + $0x130] sm:$0xf]  ;;  %v400_v13 = vld [vmem:[#allocation2 + $0xf8] sm:$0xff]  ;;  %vm408_vm1 = vcmask 818176   ;;  %vm789_vm2 = vcmask 1046528  }
  0x27   : > { %s1709_s9 = smov (!%p228_p6, %s1141_s9), 15  ;;  %1148 = vmatpush1.msk.msra.mxu0 %vm457_vm0, %v405_v7  ;;  %1218 = vmatprep.subr.msk.mxu1 %vm457_vm0, %v407_v12  ;;  %v404_v14 = vld [vmem:[#allocation2 + $0x118] sm:$0xff]  ;;  %v399_v15 = vld [vmem:[#allocation2 + $0xf0] sm:$0xff]  ;;  %v397_v18 = vld [vmem:[#allocation2 + $0xe0] sm:$0xff]  ;;  %vm862_vm3 = vcmask 1045504   ;;  %s224_s28 = sand.u32 1, %s1406_s16  }
  0x28   : > { %s1187_s10 = sshll.u32 %s1709_s9, 4  ;;  %475 = vmatprep.subr.mxu0 %v403_v10  ;;  %1219 = vmatpush3.msk.msra.mxu1 %vm457_vm0, %v407_v12  ;;  %v401_v19 = vld [vmem:[#allocation2 + $0x100] sm:$0xff]  ;;  %v396_v20 = vld [vmem:[#allocation2 + $0xd8] sm:$0xff]  ;;  %v394_v21 = vld [vmem:[#allocation2 + $0xc8] sm:$0xff]  ;;  %s1651_s29 = sshll.u32 %s224_s28, 3  ;;  %vm1015_vm4 = vcmask 1041409  }
  0x29   : > { %s1523_s13 = scalar_lea.vmem %s1696_s1, %s1187_s10  ;;  %476 = vmatpush1.msra.mxu0 %v402_v11  ;;  %1220 = vmatprep.subr.mxu1 %v404_v14  ;;  %v398_v22 = vld [vmem:[#allocation2 + $0xe8] sm:$0xff]  ;;  %v393_v25 = vld [vmem:[#allocation2 + $0xc0] sm:$0xff]  ;;  %v391_v26 = vld [vmem:[#allocation2 + $0xb0] sm:$0xff]  ;;  %s1550_s22 = scalar_lea.vmem %s1695_s0, %s1187_s10  ;;  %vm1018_vm5 = vcmask 1042434   ;;  %vm1021_vm6 = vcmask 1043459   ;;  %vm1024_vm7 = vcmask 1044484  }
  0x2a   : > { %v259_v2 = vld [vmem:[%s1523_s13 + $0x10] sm:$0xff]  ;;  %v257_v3 = vld [vmem:[%s1523_s13] sm:$0xff]  ;;  %v260_v4 = vld [vmem:[%s1523_s13 + $0x18] sm:$0xff]  ;;  %477 = vmatprep.subr.mxu0 %v400_v13  ;;  %1221 = vmatpush3.msra.mxu1 %v404_v14  ;;  %vm1027_vm8 = vcmask 1045509   ;;  %vm1030_vm9 = vcmask 1046534   ;;  %s1184_s30 = sshll.u32 %s1468_s19, 7 }
  0x2b   : > { %285 = vperm.xlu1 %1323, %v259_v2   ;;  %275 = vperm.xlu0 %1322, %v257_v3   ;;  %v258_v5 = vld [vmem:[%s1523_s13 + $0x8] sm:$0xff]  ;;  %v261_v9 = vld [vmem:[%s1523_s13 + $0x20] sm:$0xff]  ;;  %v264_v16 = vld [vmem:[%s1523_s13 + $0x38] sm:$0xff]  ;;  %s226_s5 = scalar_lea.vmem [#allocation5], %s1651_s29  ;;  %vm1033_vm10 = vcmask 1047559   ;;  %s1658_s9 = scalar_lea.hbm %s1699_s4, %s1184_s30 }
  0x2c   : > { %v262_v8 = vld [vmem:[%s1523_s13 + $0x28] sm:$0xff]  ;;  %v263_v17 = vld [vmem:[%s1523_s13 + $0x30] sm:$0xff]  ;;  %478 = vmatpush1.msra.mxu0 %v399_v15  ;;  %v265_v24 = vld [vmem:[%s1523_s13 + $0x40] sm:$0xff]  ;;  %1222 = vmatprep.subr.mxu1 %v401_v19  ;;  %s1051_s6 = sshll.u32 %s226_s5, 4  ;;  %s1038_s10 = scalar_lea.sflag [#allocation4], %s224_s28  ;;  %s1052_s6 = int_to_ptr.vmem [resolvable:$true] %s1051_s6 }
  0x2d   : > { %v266_v23 = vld [vmem:[%s1523_s13 + $0x48] sm:$0xff]  ;;  %479 = vmatprep.subr.mxu0 %v397_v18  ;;  %1223 = vmatpush3.msra.mxu1 %v401_v19  ;;  %v395_v27 = vld [vmem:[#allocation2 + $0xd0] sm:$0xff]  ;;  %v268_v29 = vld [vmem:[%s1523_s13 + $0x58] sm:$0xff]  ;;  %s1350_s11 = scalar_lea.vmem %s1052_s6, 128  ;;  %s1421_s19 = smov [#allocation5]  }
  0x2e   : > { %480 = vmatpush1.msra.mxu0 %v396_v20  ;;  %1224 = vmatprep.subr.mxu1 %v398_v22  ;;  %v390_v28 = vld [vmem:[#allocation2 + $0xa8] sm:$0xff]  ;;  %v267_v30 = vld [vmem:[%s1523_s13 + $0x50] sm:$0xff]  ;;  %v388_v31 = vld [vmem:[#allocation2 + $0x98] sm:$0xff]  ;;  %p1351_p8 = scmp.ne.s32.totalorder %s1052_s6, %s1350_s11  ;;  %s1354_s12 = sshll.u32 %s1421_s19, 4  ;;  %s1355_s12 = int_to_ptr.vmem [resolvable:$false] %s1354_s12 }
  0x2f   : > { %290 = vperm.xlu1 %1323, %v260_v4   ;;  %280 = vperm.xlu0 %1322, %v258_v5   ;;  %v392_v32 = vld [vmem:[#allocation2 + $0xb8] sm:$0xff]  ;;  %v387_v33 = vld [vmem:[#allocation2 + $0x90] sm:$0xff]  ;;  %v385_v34 = vld [vmem:[#allocation2 + $0x80] sm:$0xff]  ;;  %p1357_p11 = scmp.lt.s32.totalorder %s1052_s6, %s1355_s12 }
  0x30   : > { %481 = vmatprep.subr.mxu0 %v394_v21  ;;  %1225 = vmatpush3.msra.mxu1 %v398_v22  ;;  %v389_v35 = vld [vmem:[#allocation2 + $0xa0] sm:$0xff]  ;;  %v270_v36 = vld [vmem:[%s1523_s13 + $0x68] sm:$0xff]  ;;  %v384_v38 = vld [vmem:[#allocation2 + $0x78] sm:$0xff]  ;;  %p1352_p9 = pnand %p1351_p8, %p1485_p5 }
  0x31   : > { %482 = vmatpush1.msra.mxu0 %v393_v25  ;;  %1226 = vmatprep.subr.mxu1 %v395_v27  ;;  %v269_v37 = vld [vmem:[%s1523_s13 + $0x60] sm:$0xff]  ;;  %v382_v39 = vld [vmem:[#allocation2 + $0x68] sm:$0xff]  ;;  %v272_v42 = vld [vmem:[%s1523_s13 + $0x78] sm:$0xff] }
  0x32   : > { %483 = vmatprep.subr.mxu0 %v391_v26  ;;  %1227 = vmatpush3.msra.mxu1 %v395_v27  ;;  %v386_v40 = vld [vmem:[#allocation2 + $0x88] sm:$0xff]  ;;  %v381_v41 = vld [vmem:[#allocation2 + $0x60] sm:$0xff]  ;;  %v271_v43 = vld [vmem:[%s1523_s13 + $0x70] sm:$0xff]  ;;  %p1353_p10 = pneg %p1352_p9  ;;  %s1356_s13 = scalar_lea.vmem %s1355_s12, 256 }
  0x33   : > { %300 = vperm.xlu1 %1323, %v262_v8   ;;  %295 = vperm.xlu0 %1322, %v261_v9   ;;  %v379_v44 = vld [vmem:[#allocation2 + $0x50] sm:$0xff]  ;;  %v378_v46 = vld [vmem:[#allocation2 + $0x48] sm:$0xff]  ;;  %v376_v47 = vld [vmem:[#allocation2 + $0x38] sm:$0xff]  ;;  %p1358_p12 = scmp.lt.s32.totalorder %s1356_s13, %s1350_s11 }
  0x34   : > { %484 = vmatpush1.msra.mxu0 %v390_v28  ;;  %1228 = vmatprep.subr.mxu1 %v392_v32  ;;  %v383_v45 = vld [vmem:[#allocation2 + $0x70] sm:$0xff]  ;;  %v380_v48 = vld [vmem:[#allocation2 + $0x58] sm:$0xff]  ;;  %v373_v50 = vld [vmem:[#allocation2 + $0x20] sm:$0xff] }
  0x35   : > { %485 = vmatprep.subr.mxu0 %v388_v31  ;;  %1229 = vmatpush3.msra.mxu1 %v392_v32  ;;  %v375_v49 = vld [vmem:[#allocation2 + $0x30] sm:$0xff]  ;;  %v377_v51 = vld [vmem:[#allocation2 + $0x40] sm:$0xff]  ;;  %v372_v52 = vld [vmem:[#allocation2 + $0x18] sm:$0xff]  ;;  %p1359_p13 = por %p1358_p12, %p1357_p11 }
  0x36   : > { %486 = vmatpush1.msra.mxu0 %v387_v33  ;;  %1230 = vmatprep.subr.mxu1 %v389_v35  ;;  %v370_v53 = vld [vmem:[#allocation2 + $0x8] sm:$0xff]  ;;  %v369_v55 = vld [vmem:[#allocation2] sm:$0xff]  ;;  %v371_v56 = vld [vmem:[#allocation2 + $0x10] sm:$0xff] }
  0x37   : > { %310 = vperm.xlu1 %1323, %v264_v16   ;;  %305 = vperm.xlu0 %1322, %v263_v17   ;;  %v374_v54 = vld [vmem:[#allocation2 + $0x28] sm:$0xff]  ;;  %v241_v57 = vld [vmem:[%s1550_s22] sm:$0xff]  ;;  %v243_v60 = vld [vmem:[%s1550_s22 + $0x10] sm:$0xff]  ;;  %p1360_p0 = pnand %p1359_p13, %p1353_p10 }
  0x38   : > { %487 = vmatprep.subr.mxu0 %v385_v34  ;;  %1231 = vmatpush3.msra.mxu1 %v389_v35  ;;  %v242_v62 = vld [vmem:[%s1550_s22 + $0x8] sm:$0xff]  ;;  %v244_v2 = vld [vmem:[%s1550_s22 + $0x18] sm:$0xff]  ;;  %v245_v5 = vld [vmem:[%s1550_s22 + $0x20] sm:$0xff] }
  0x39   : > { %488 = vmatpush1.msra.mxu0 %v384_v38  ;;  %1232 = vmatprep.subr.mxu1 %v386_v40  ;;  %v246_v10 = vld [vmem:[%s1550_s22 + $0x28] sm:$0xff]  ;;  %v247_v11 = vld [vmem:[%s1550_s22 + $0x30] sm:$0xff]  ;;  %v248_v16 = vld [vmem:[%s1550_s22 + $0x38] sm:$0xff] }
  0x3a   : > { %489 = vmatprep.subr.mxu0 %v382_v39  ;;  %1233 = vmatpush3.msra.mxu1 %v386_v40  ;;  %v249_v17 = vld [vmem:[%s1550_s22 + $0x40] sm:$0xff]  ;;  %v250_v22 = vld [vmem:[%s1550_s22 + $0x48] sm:$0xff]  ;;  %v252_v28 = vld [vmem:[%s1550_s22 + $0x58] sm:$0xff] }
  0x3b   : > { %320 = vperm.xlu1 %1323, %v266_v23   ;;  %315 = vperm.xlu0 %1322, %v265_v24   ;;  %v251_v23 = vld [vmem:[%s1550_s22 + $0x50] sm:$0xff]  ;;  %v254_v34 = vld [vmem:[%s1550_s22 + $0x68] sm:$0xff]  ;;  %v256_v40 = vld [vmem:[%s1550_s22 + $0x78] sm:$0xff] }
  0x3c   : > { %490 = vmatpush1.msra.mxu0 %v381_v41  ;;  %1234 = vmatprep.subr.mxu1 %v383_v45  ;;  %v255_v35 = vld [vmem:[%s1550_s22 + $0x70] sm:$0xff] }
  0x3d   : > { %491 = vmatprep.subr.mxu0 %v379_v44  ;;  %1235 = vmatpush3.msra.mxu1 %v383_v45 }
  0x3e   : > { %492 = vmatpush1.msra.mxu0 %v378_v46  ;;  %1236 = vmatprep.subr.mxu1 %v380_v48 }
  0x3f   : > { %330 = vperm.xlu1 %1323, %v268_v29   ;;  %325 = vperm.xlu0 %1322, %v267_v30   ;;  %v253_v29 = vld [vmem:[%s1550_s22 + $0x60] sm:$0xff] }
  0x40   : > { %493 = vmatprep.subr.mxu0 %v376_v47  ;;  %1237 = vmatpush3.msra.mxu1 %v380_v48 }
  0x41   : > { %494 = vmatpush1.msra.mxu0 %v375_v49  ;;  %1238 = vmatprep.subr.mxu1 %v377_v51 }
  0x42   : > { %495 = vmatprep.subr.mxu0 %v373_v50  ;;  %1239 = vmatpush3.msra.mxu1 %v377_v51 }
  0x43   : > { %340 = vperm.xlu1 %1323, %v270_v36   ;;  %335 = vperm.xlu0 %1322, %v269_v37  }
  0x44   : > { %496 = vmatpush1.msra.mxu0 %v372_v52  ;;  %1240 = vmatprep.subr.mxu1 %v374_v54 }
  0x45   : > { %497 = vmatprep.subr.mxu0 %v370_v53  ;;  %1241 = vmatpush3.msra.mxu1 %v374_v54 }
  0x46   : > { %498 = vmatpush1.msra.mxu0 %v369_v55  ;;  %1242 = vmatprep.subr.mxu1 %v371_v56 }
  0x47   : > { %350 = vperm.xlu1 %1323, %v272_v42   ;;  %345 = vperm.xlu0 %1322, %v271_v43  }
  0x48   : > { %1243 = vmatpush3.msra.mxu1 %v371_v56 }
  0xa6   : > { %v286_v58 = vpop.permute.xlu1 %285  ;;  %v276_v59 = vpop.permute.xlu0 %275 }
  0xa7   : > { %v353_v61 = vmul.f32 %v276_v59, %v241_v57  ;;  %v355_v63 = vmul.f32 %v286_v58, %v243_v60 }
  0xa9   : > { %1149 = vmatmul.mubr.msk.f32.vlgmr.msra.gmra.mxu0 %vm408_vm1, %v353_v61  ;;  %1244 = vmatprep.mubr.msk.f32.mxu1 %vm408_vm1, %v353_v61 }
  0xaa   : > { %v291_v0 = vpop.permute.xlu1 %290  ;;  %v281_v3 = vpop.permute.xlu0 %280  ;;  %537 = vmatprep.mubr.f32.mxu0 %v1420_v1 }
  0xab   : > { %v354_v4 = vmul.f32 %v281_v3, %v242_v62  ;;  %v356_v6 = vmul.f32 %v291_v0, %v244_v2 }
  0xad   : > { %1150 = vmatmul.mubr.msk.f32.gmra.mxu0 %vm408_vm1, %v354_v4  ;;  %1245 = vmatmul.mubr.msk.f32.vlgmr.msra.gmra.mxu1 %vm408_vm1, %v354_v4 }
  0xae   : > { %v301_v7 = vpop.permute.xlu1 %300  ;;  %v296_v8 = vpop.permute.xlu0 %295  ;;  %543 = vmatprep.mubr.f32.mxu0 %v1420_v1  ;;  %1247 = vmatprep.mubr.msk.f32.mxu1 %vm408_vm1, %v355_v63 }
  0xaf   : > { %v357_v9 = vmul.f32 %v296_v8, %v245_v5  ;;  %v358_v14 = vmul.f32 %v301_v7, %v246_v10 }
  0xb1   : > { %1151 = vmatmul.mubr.msk.f32.gmra.mxu0 %vm408_vm1, %v355_v63  ;;  %1248 = vmatmul.mubr.msk.f32.gmra.mxu1 %vm408_vm1, %v356_v6 }
  0xb2   : > { %v311_v12 = vpop.permute.xlu1 %310  ;;  %v306_v13 = vpop.permute.xlu0 %305  ;;  %1250 = vmatprep.mubr.msk.f32.mxu1 %vm408_vm1, %v357_v9  ;;  %549 = vmatprep.mubr.f32.mxu0 %v1420_v1 }
  0xb3   : > { %v359_v15 = vmul.f32 %v306_v13, %v247_v11  ;;  %v360_v20 = vmul.f32 %v311_v12, %v248_v16 }
  0xb5   : > { %1152 = vmatmul.mubr.msk.f32.gmra.mxu0 %vm408_vm1, %v356_v6  ;;  %1251 = vmatmul.mubr.msk.f32.gmra.mxu1 %vm408_vm1, %v358_v14 }
  0xb6   : > { %v321_v18 = vpop.permute.xlu1 %320  ;;  %v316_v19 = vpop.permute.xlu0 %315  ;;  %1253 = vmatprep.mubr.msk.f32.mxu1 %vm408_vm1, %v359_v15  ;;  %555 = vmatprep.mubr.f32.mxu0 %v1420_v1 }
  0xb7   : > { %v361_v21 = vmul.f32 %v316_v19, %v249_v17  ;;  %v362_v26 = vmul.f32 %v321_v18, %v250_v22 }
  0xb9   : > { %1153 = vmatmul.mubr.msk.f32.gmra.mxu0 %vm408_vm1, %v357_v9  ;;  %1254 = vmatmul.mubr.msk.f32.gmra.mxu1 %vm408_vm1, %v360_v20 }
  0xba   : > { %v331_v24 = vpop.permute.xlu1 %330  ;;  %v326_v25 = vpop.permute.xlu0 %325  ;;  %1256 = vmatprep.mubr.msk.f32.mxu1 %vm408_vm1, %v361_v21  ;;  %561 = vmatprep.mubr.f32.mxu0 %v1420_v1 }
  0xbb   : > { %v363_v27 = vmul.f32 %v326_v25, %v251_v23  ;;  %v364_v32 = vmul.f32 %v331_v24, %v252_v28 }
  0xbd   : > { %1154 = vmatmul.mubr.msk.f32.gmra.mxu0 %vm408_vm1, %v358_v14  ;;  %1257 = vmatmul.mubr.msk.f32.gmra.mxu1 %vm408_vm1, %v362_v26 }
  0xbe   : > { %v341_v30 = vpop.permute.xlu1 %340  ;;  %v336_v31 = vpop.permute.xlu0 %335  ;;  %1259 = vmatprep.mubr.msk.f32.mxu1 %vm408_vm1, %v363_v27  ;;  %567 = vmatprep.mubr.f32.mxu0 %v1420_v1 }
  0xbf   : > { %v365_v33 = vmul.f32 %v336_v31, %v253_v29  ;;  %v366_v37 = vmul.f32 %v341_v30, %v254_v34 }
  0xc1   : > { %1155 = vmatmul.mubr.msk.f32.gmra.mxu0 %vm408_vm1, %v359_v15  ;;  %1260 = vmatmul.mubr.msk.f32.gmra.mxu1 %vm408_vm1, %v364_v32 }
  0xc2   : > { %v346_v36 = vpop.permute.xlu0 %345  ;;  %1262 = vmatprep.mubr.msk.f32.mxu1 %vm408_vm1, %v365_v33  ;;  %573 = vmatprep.mubr.f32.mxu0 %v1420_v1  ;;  %v351_v39 = vpop.permute.xlu1 %350 }
  0xc3   : > { %v367_v38 = vmul.f32 %v346_v36, %v255_v35  ;;  %v368_v41 = vmul.f32 %v351_v39, %v256_v40 }
  0xc5   : > { %1156 = vmatmul.mubr.msk.f32.gmra.mxu0 %vm408_vm1, %v360_v20  ;;  %1263 = vmatmul.mubr.msk.f32.gmra.mxu1 %vm408_vm1, %v366_v37 }
  0xc6   : > { %1265 = vmatprep.mubr.msk.f32.mxu1 %vm408_vm1, %v367_v38  ;;  %579 = vmatprep.mubr.f32.mxu0 %v1420_v1 }
  0xc9   : > { %1157 = vmatmul.mubr.msk.f32.gmra.mxu0 %vm408_vm1, %v361_v21  ;;  %1266 = vmatmul.mubr.msk.f32.gmra.mxu1 %vm408_vm1, %v368_v41 }
  0xca   : > { %585 = vmatprep.mubr.f32.mxu0 %v1420_v1 }
  0xcd   : > { %1158 = vmatmul.mubr.msk.f32.gmra.mxu0 %vm408_vm1, %v362_v26 }
  0xce   : > { %591 = vmatprep.mubr.f32.mxu0 %v1420_v1 }
  0xd1   : > { %1159 = vmatmul.mubr.msk.f32.gmra.mxu0 %vm408_vm1, %v363_v27 }
  0xd2   : > { %597 = vmatprep.mubr.f32.mxu0 %v1420_v1 }
  0xd5   : > { %1160 = vmatmul.mubr.msk.f32.gmra.mxu0 %vm408_vm1, %v364_v32 }
  0xd6   : > { %603 = vmatprep.mubr.f32.mxu0 %v1420_v1 }
  0xd9   : > { %1161 = vmatmul.mubr.msk.f32.gmra.mxu0 %vm408_vm1, %v365_v33 }
  0xda   : > { %609 = vmatprep.mubr.f32.mxu0 %v1420_v1 }
  0xdd   : > { %1162 = vmatmul.mubr.msk.f32.gmra.mxu0 %vm408_vm1, %v366_v37 }
  0xde   : > { %615 = vmatprep.mubr.f32.mxu0 %v1420_v1 }
  0xe1   : > { %1163 = vmatmul.mubr.msk.f32.gmra.mxu0 %vm408_vm1, %v367_v38 }
  0xe2   : > { %621 = vmatprep.mubr.f32.mxu0 %v1420_v1 }
  0xe5   : > { %1164 = vmatmul.mubr.msk.f32.gmra.mxu0 %vm408_vm1, %v368_v41 }
 0x169   : > { %v533_v42 = vpop.f32.mrf.mxu0 }
 0x16b   : > { %v535_v43 = vpop.f32.mrf.mxu0 }
 0x16c   : > { %v790_v11 = vrot.slane %v535_v43, 1 }
 0x16d   : > { %v539_v44 = vpop.f32.mrf.mxu0  ;;  %v1615_v45 = vpop.f32.mrf.mxu1 }
 0x16e   : > { %v864_v12 = vrot.slane %v1615_v45, 2 }
 0x16f   : > { %v541_v46 = vpop.f32.mrf.mxu0  ;;  %v1617_v47 = vpop.f32.mrf.mxu1 }
 0x170   : > { %v791_v4 = vrot.slane %v541_v46, 1  ;;  %v863_v31 = vrot.slane %v1617_v47, 2 }
 0x171   : > { %v545_v48 = vpop.f32.mrf.mxu0  ;;  %v1249_v49 = vpop.f32.mrf.mxu1 }
 0x172   : > { %v867_v15 = vrot.slane %v1249_v49, 2  ;;  %v792_v20 = vsel %vm789_vm2, %v790_v11, %v791_v4  ;;  %v831_v30 = vadd.f32 %v791_v4, %v539_v44 }
 0x173   : > { %v547_v50 = vpop.f32.mrf.mxu0  ;;  %v704_v51 = vpop.f32.mrf.mxu1  ;;  %v830_v34 = vadd.f32 %v792_v20, %v533_v42 }
 0x174   : > { %v793_v5 = vrot.slane %v547_v50, 1  ;;  %v866_v16 = vrot.slane %v704_v51, 2 }
 0x175   : > { %v551_v52 = vpop.f32.mrf.mxu0  ;;  %v1252_v54 = vpop.f32.mrf.mxu1 }
 0x176   : > { %v870_v21 = vrot.slane %v1252_v54, 2  ;;  %v868_v35 = vsel %vm862_vm3, %v866_v16, %v867_v15 }
 0x177   : > { %v553_v53 = vpop.f32.mrf.mxu0  ;;  %v714_v1 = vpop.f32.mrf.mxu1 }
 0x178   : > { %v794_v62 = vrot.slane %v553_v53, 1  ;;  %v869_v26 = vrot.slane %v714_v1, 2  ;;  %v904_v53 = vadd.f32 %v864_v12, %v831_v30 }
 0x179   : > { %v557_v55 = vpop.f32.mrf.mxu0  ;;  %v1255_v59 = vpop.f32.mrf.mxu1 }
 0x17a   : > { %v833_v7 = vadd.f32 %v794_v62, %v551_v52  ;;  %v795_v13 = vsel %vm789_vm2, %v793_v5, %v794_v62  ;;  %v873_v32 = vrot.slane %v1255_v59, 2  ;;  %v919_v4 = vsel %vm862_vm3, %v904_v53, -inf }
 0x17b   : > { %v559_v56 = vpop.f32.mrf.mxu0  ;;  %v724_v63 = vpop.f32.mrf.mxu1  ;;  %v832_v24 = vadd.f32 %v795_v13, %v545_v48  ;;  %v871_v48 = vsel %vm862_vm3, %v869_v26, %v870_v21 }
 0x17c   : > { %v796_v8 = vrot.slane %v559_v56, 1  ;;  %v906_v25 = vadd.f32 %v867_v15, %v833_v7  ;;  %v872_v27 = vrot.slane %v724_v63, 2 }
 0x17d   : > { %v563_v57 = vpop.f32.mrf.mxu0  ;;  %v1258_v9 = vpop.f32.mrf.mxu1  ;;  %v905_v45 = vadd.f32 %v868_v35, %v832_v24 }
 0x17e   : > { %v927_v46 = vsel %vm862_vm3, %v906_v25, -inf  ;;  %v874_v44 = vsel %vm862_vm3, %v872_v27, %v873_v32  ;;  %v876_v50 = vrot.slane %v1258_v9, 2 }
 0x17f   : > { %v565_v58 = vpop.f32.mrf.mxu0  ;;  %v734_v28 = vpop.f32.mrf.mxu1 }
 0x180   : > { %v797_v2 = vrot.slane %v565_v58, 1  ;;  %v875_v39 = vrot.slane %v734_v28, 2 }
 0x181   : > { %v569_v60 = vpop.f32.mrf.mxu0  ;;  %v1261_v47 = vpop.f32.mrf.mxu1 }
 0x182   : > { %v798_v17 = vsel %vm789_vm2, %v796_v8, %v797_v2  ;;  %v835_v18 = vadd.f32 %v797_v2, %v563_v57  ;;  %v877_v57 = vsel %vm862_vm3, %v875_v39, %v876_v50 }
 0x183   : > { %v571_v61 = vpop.f32.mrf.mxu0  ;;  %v834_v33 = vadd.f32 %v798_v17, %v557_v55  ;;  %v879_v17 = vrot.slane %v1261_v47, 2 }
 0x184   : > { %v799_v14 = vrot.slane %v571_v61, 1  ;;  %v908_v36 = vadd.f32 %v870_v21, %v835_v18  ;;  %v744_v61 = vpop.f32.mrf.mxu1 }
 0x185   : > { %v575_v0 = vpop.f32.mrf.mxu0  ;;  %v907_v42 = vadd.f32 %v871_v48, %v834_v33  ;;  %v878_v8 = vrot.slane %v744_v61, 2 }
 0x186   : > { %v935_v54 = vsel %vm862_vm3, %v908_v36, -inf }
 0x187   : > { %v577_v3 = vpop.f32.mrf.mxu0  ;;  %v936_v2 = vmax.f32 %v907_v42, %v935_v54 }
 0x188   : > { %v800_v6 = vrot.slane %v577_v3, 1 }
 0x189   : > { %v581_v10 = vpop.f32.mrf.mxu0  ;;  %v937_v16 = vrot.slane %v936_v2, 4 }
 0x18a   : > { %v801_v22 = vsel %vm789_vm2, %v799_v14, %v800_v6  ;;  %v837_v23 = vadd.f32 %v800_v6, %v575_v0  ;;  %v865_v0 = vsel %vm862_vm3, %v863_v31, %v864_v12  ;;  %v1264_v14 = vpop.f32.mrf.mxu1 }
 0x18b   : > { %v583_v19 = vpop.f32.mrf.mxu0  ;;  %v836_v37 = vadd.f32 %v801_v22, %v569_v60  ;;  %v928_v60 = vmax.f32 %v905_v45, %v927_v46  ;;  %v903_v5 = vadd.f32 %v865_v0, %v830_v34  ;;  %v938_v30 = vmax.f32 %v936_v2, %v937_v16 }
 0x18c   : > { %v910_v40 = vadd.f32 %v873_v32, %v837_v23  ;;  %v802_v41 = vrot.slane %v583_v19, 1  ;;  %v880_v23 = vsel %vm862_vm3, %v878_v8, %v879_v17  ;;  %v754_v27 = vpop.f32.mrf.mxu1  ;;  %v882_v48 = vrot.slane %v1264_v14, 2 }
 0x18d   : > { %v587_v29 = vpop.f32.mrf.mxu0  ;;  %v909_v55 = vadd.f32 %v874_v44, %v836_v37  ;;  %v929_v13 = vrot.slane %v928_v60, 4  ;;  %v920_v19 = vmax.f32 %v903_v5, %v919_v4  ;;  %v881_v36 = vrot.slane %v754_v27, 2 }
 0x18e   : > { %v943_v58 = vsel %vm862_vm3, %v910_v40, -inf  ;;  %v939_v46 = vrot.slane %v938_v30, 2 }
 0x18f   : > { %v589_v38 = vpop.f32.mrf.mxu0  ;;  %v944_v6 = vmax.f32 %v909_v55, %v943_v58  ;;  %v930_v26 = vmax.f32 %v928_v60, %v929_v13  ;;  %v921_v32 = vrot.slane %v920_v19, 4  ;;  %v883_v53 = vsel %vm862_vm3, %v881_v36, %v882_v48 }
 0x190   : > { %v803_v43 = vrot.slane %v589_v38, 1  ;;  %v940_v60 = vmax.f32 %v938_v30, %v939_v46 }
 0x191   : > { %v593_v49 = vpop.f32.mrf.mxu0  ;;  %v945_v20 = vrot.slane %v944_v6, 4  ;;  %v931_v40 = vrot.slane %v930_v26, 2 }
 0x192   : > { %v804_v51 = vsel %vm789_vm2, %v802_v41, %v803_v43  ;;  %v839_v52 = vadd.f32 %v803_v43, %v587_v29  ;;  %v1267_v41 = vpop.f32.mrf.mxu1 }
 0x193   : > { %v838_v56 = vadd.f32 %v804_v51, %v581_v10  ;;  %v595_v1 = vpop.f32.mrf.mxu0  ;;  %v946_v33 = vmax.f32 %v944_v6, %v945_v20 }
 0x194   : > { %v912_v59 = vadd.f32 %v876_v50, %v839_v52  ;;  %v805_v10 = vrot.slane %v595_v1, 1  ;;  %v764_v1 = vpop.f32.mrf.mxu1 }
 0x195   : > { %v911_v62 = vadd.f32 %v877_v57, %v838_v56  ;;  %v599_v63 = vpop.f32.mrf.mxu0  ;;  %v947_v50 = vrot.slane %v946_v33, 2  ;;  %v932_v56 = vmax.f32 %v930_v26, %v931_v40 }
 0x196   : > { %v951_v3 = vsel %vm862_vm3, %v912_v59, -inf }
 0x197   : > { %v601_v7 = vpop.f32.mrf.mxu0  ;;  %v952_v9 = vmax.f32 %v911_v62, %v951_v3  ;;  %v884_v3 = vrot.slane %v764_v1, 2 }
 0x198   : > { %v806_v11 = vrot.slane %v601_v7, 1  ;;  %v933_v7 = vrot.slane %v932_v56, 1 }
 0x199   : > { %v605_v15 = vpop.f32.mrf.mxu0  ;;  %v953_v24 = vrot.slane %v952_v9, 4 }
 0x19a   : > { %v807_v18 = vsel %vm789_vm2, %v805_v10, %v806_v11  ;;  %v841_v12 = vadd.f32 %v806_v11, %v599_v63  ;;  %v948_v63 = vmax.f32 %v946_v33, %v947_v50  ;;  %v941_v10 = vrot.slane %v940_v60, 1 }
 0x19b   : > { %v840_v21 = vadd.f32 %v807_v18, %v593_v49  ;;  %v607_v22 = vpop.f32.mrf.mxu0  ;;  %v954_v37 = vmax.f32 %v952_v9, %v953_v24  ;;  %v922_v49 = vmax.f32 %v920_v19, %v921_v32  ;;  %v885_v11 = vrot.slane %v1267_v41, 2 }
 0x19c   : > { %v914_v25 = vadd.f32 %v879_v17, %v841_v12  ;;  %v808_v38 = vrot.slane %v607_v22, 1  ;;  %v949_v16 = vrot.slane %v948_v63, 1 }
 0x19d   : > { %v913_v28 = vadd.f32 %v880_v23, %v840_v21  ;;  %v611_v29 = vpop.f32.mrf.mxu0  ;;  %v955_v54 = vrot.slane %v954_v37, 2  ;;  %v923_v62 = vrot.slane %v922_v49, 2  ;;  %v886_v12 = vsel %vm862_vm3, %v884_v3, %v885_v11 }
 0x19e   : > { %v959_v31 = vsel %vm862_vm3, %v914_v25, -inf  ;;  %v934_v21 = vmax.f32 %v932_v56, %v933_v7  ;;  %v942_v25 = vmax.f32 %v940_v60, %v941_v10 }
 0x19f   : > { %v960_v34 = vmax.f32 %v913_v28, %v959_v31  ;;  %v613_v35 = vpop.f32.mrf.mxu0  ;;  %v956_v4 = vmax.f32 %v954_v37, %v955_v54  ;;  %v950_v28 = vmax.f32 %v948_v63, %v949_v16  ;;  %v1182_v31 = vld [vmem:[%s1698_s3] ss:$0 sm:$0xff] }
 0x1a0   : > { %v809_v39 = vrot.slane %v613_v35, 1  ;;  %v991_v33 = vadd.f32 %v1182_v31, %v934_v21  ;;  %v992_v37 = vadd.f32 %v1182_v31, %v942_v25 }
 0x1a1   : > { %v961_v43 = vrot.slane %v960_v34, 4  ;;  %v617_v45 = vpop.f32.mrf.mxu0  ;;  %v957_v19 = vrot.slane %v956_v4, 1 }
 0x1a2   : > { %v810_v44 = vsel %vm789_vm2, %v808_v38, %v809_v39  ;;  %v843_v47 = vadd.f32 %v809_v39, %v611_v29  ;;  %v993_v39 = vadd.f32 %v1182_v31, %v950_v28 }
 0x1a3   : > { %v962_v42 = vmax.f32 %v960_v34, %v961_v43  ;;  %v842_v51 = vadd.f32 %v810_v44, %v605_v15  ;;  %v619_v52 = vpop.f32.mrf.mxu0  ;;  %v924_v15 = vmax.f32 %v922_v49, %v923_v62  ;;  %v958_v32 = vmax.f32 %v956_v4, %v957_v19 }
 0x1a4   : > { %v916_v55 = vadd.f32 %v882_v48, %v843_v47  ;;  %v811_v5 = vrot.slane %v619_v52, 1  ;;  %v1000_v44 = vmax.f32 %v992_v37, 0.0  ;;  %v1001_v50 = vmax.f32 %v993_v39, 0.0 }
 0x1a5   : > { %v963_v57 = vrot.slane %v962_v42, 2  ;;  %v915_v58 = vadd.f32 %v883_v53, %v842_v51  ;;  %v623_v59 = vpop.f32.mrf.mxu0  ;;  %v925_v27 = vrot.slane %v924_v15, 1  ;;  %v994_v43 = vadd.f32 %v1182_v31, %v958_v32 }
 0x1a6   : > { %v967_v61 = vsel %vm862_vm3, %v916_v55, -inf  ;;  %v1017_v55 = vrot.slane %v1000_v44, 6 }
 0x1a7   : > { %v968_v0 = vmax.f32 %v915_v58, %v967_v61  ;;  %v625_v2 = vpop.f32.mrf.mxu0  ;;  %v964_v8 = vmax.f32 %v962_v42, %v963_v57  ;;  %v926_v38 = vmax.f32 %v924_v15, %v925_v27  ;;  %v1002_v51 = vmax.f32 %v994_v43, 0.0 }
 0x1a8   : > { %v812_v6 = vrot.slane %v625_v2, 1  ;;  %v1020_v57 = vrot.slane %v1001_v50, 5 }
 0x1a9   : > { %v969_v9 = vrot.slane %v968_v0, 4  ;;  %v965_v22 = vrot.slane %v964_v8, 1  ;;  %v990_v49 = vadd.f32 %v1182_v31, %v926_v38 }
 0x1aa   : > { %v813_v13 = vsel %vm789_vm2, %v811_v5, %v812_v6  ;;  %v845_v14 = vadd.f32 %v812_v6, %v623_v59  ;;  %v1023_v59 = vrot.slane %v1002_v51, 4 }
 0x1ab   : > { %v970_v17 = vmax.f32 %v968_v0, %v969_v9  ;;  %v844_v18 = vadd.f32 %v813_v13, %v617_v45  ;;  %v966_v34 = vmax.f32 %v964_v8, %v965_v22  ;;  %v999_v45 = vmax.f32 %v991_v33, 0.0 }
 0x1ac   : > { %v918_v20 = vadd.f32 %v885_v11, %v845_v14  ;;  %v998_v1 = vmax.f32 %v990_v49, 0.0 }
 0x1ad   : > { %v971_v23 = vrot.slane %v970_v17, 2  ;;  %v917_v24 = vadd.f32 %v886_v12, %v844_v18  ;;  %v995_v46 = vadd.f32 %v1182_v31, %v966_v34  ;;  %v1014_v52 = vrot.slane %v999_v45, 7 }
 0x1ae   : > { %v975_v26 = vsel %vm862_vm3, %v918_v20, -inf }
 0x1af   : > { %v972_v29 = vmax.f32 %v970_v17, %v971_v23  ;;  %v976_v30 = vmax.f32 %v917_v24, %v975_v26  ;;  %v1003_v53 = vmax.f32 %v995_v46, 0.0  ;;  %v1016_v60 = vsel %vm1015_vm4, %v1014_v52, %v998_v1 }
 0x1b0   : > { %v1019_v63 = vsel %vm1018_vm5, %v1017_v55, %v1016_v60 }
 0x1b1   : > { %v973_v35 = vrot.slane %v972_v29, 1  ;;  %v977_v36 = vrot.slane %v976_v30, 4  ;;  %v1026_v61 = vrot.slane %v1003_v53, 3  ;;  %v1022_v3 = vsel %vm1021_vm6, %v1020_v57, %v1019_v63 }
 0x1b2   : > { %v1025_v4 = vsel %vm1024_vm7, %v1023_v59, %v1022_v3 }
 0x1b3   : > { %v974_v40 = vmax.f32 %v972_v29, %v973_v35  ;;  %v978_v41 = vmax.f32 %v976_v30, %v977_v36  ;;  %v1028_v5 = vsel %vm1027_vm8, %v1026_v61, %v1025_v4 }
 0x1b5   : > { %v979_v48 = vrot.slane %v978_v41, 2  ;;  %v996_v47 = vadd.f32 %v1182_v31, %v974_v40 }
 0x1b7   : > { %v980_v42 = vmax.f32 %v978_v41, %v979_v48  ;;  %v1004_v56 = vmax.f32 %v996_v47, 0.0 }
 0x1b9   : > { %v981_v54 = vrot.slane %v980_v42, 1  ;;  %v1029_v0 = vrot.slane %v1004_v56, 2 }
 0x1bb   : > { %v982_v58 = vmax.f32 %v980_v42, %v981_v54  ;;  %v1031_v7 = vsel %vm1030_vm9, %v1029_v0, %v1028_v5 }
 0x1bd   : > { %v997_v62 = vadd.f32 %v1182_v31, %v982_v58 }
 0x1bf   : > { %v1005_v2 = vmax.f32 %v997_v62, 0.0 }
 0x1c1   : > { %v1032_v6 = vrot.slane %v1005_v2, 1 }
 0x1c3   : > { %v1034_v8 = vsel %vm1033_vm10, %v1032_v6, %v1031_v7 }
 0x1c4   : > { %1036 = vst [vmem:[%s226_s5] sm:$0xff] %v1034_v8 }
 0x1c5   : > { %1363 = shalt.err (!%p1360_p0)
}
 0x1c6   : > { %s1364_s14 = scalar_lea.hbm %s1658_s9, 128  ;;  %s1368_s23 = scalar_lea.hbm %s1699_s4, 256 }
 0x1c7   : > { %p1365_p1 = scmp.ne.s32.totalorder %s1658_s9, %s1364_s14  ;;  %p1369_p4 = scmp.lt.s32.totalorder %s1658_s9, %s1699_s4 }
 0x1c8   : > { %p1370_p7 = scmp.lt.s32.totalorder %s1368_s23, %s1364_s14 }
 0x1c9   : > { %p1366_p2 = pnand %p1365_p1, %p1485_p5 }
 0x1ca   : > { %p1371_p6 = por %p1370_p7, %p1369_p4 }
 0x1cb   : > { %p1367_p3 = pneg %p1366_p2 }
 0x1cd   : > { %p1372_p8 = pnand %p1371_p6, %p1367_p3 }
 0x1cf   : > { %1375 = shalt.err (!%p1372_p8)
}
 0x1d0   : > { %1272 = dma.vmem_to_hbm [thread:$0]  (%p1485_p5), %s1052_s6, 128, %s1658_s9, %s1038_s10  }
 0x1d1 PF: > { %p1284_p9 = scmp.ge.s32.totalorder %s1414_s18, 2  ;;  %s1063_s29 = sand.u32 1, %s1402_s15  }
 0x1d2   : > { %p1703_p10 = scmp.ne.s32.totalorder %s1701_s26, 0  ;;  %s1064_s30 = scalar_lea.sflag [#allocation4], %s1063_s29 }
 0x1d4   : > { %p1279_p11 = pnand %p1284_p9, %p1703_p10 }
 0x1d6   : > { %p1280_p12 = pneg %p1279_p11 }
 0x1d8   : > { %1397 = dma.done.wait (%p1280_p12), %s1064_s30, 128  }
 0x1d9   : > { %1399 = vsyncadd (%p1280_p12), %s1064_s30, 4294967168  ;;  %p15_p13 = scmp.ge.s32.totalorder %s1472_s21, 4   ;;  %s1704_s15 = smov %s1406_s16 }
 0x1da   : > { %s1705_s16 = smov %s1410_s17  ;;  %s1706_s17 = smov %s1483_s24 }
 0x1db   : > { %s1707_s18 = smov %s1472_s21  ;;  %17 = sbr.rel (!%p15_p13) target bundleno = 4 (0x4), region = 79 }
 0x1e0   :  { %1069 = vsyncpa [#allocation3], 1 }
 0x1e1   :  { %1071 = vsyncpa [#allocation3 + $0x1], 1 }
 0x1e2   :  { %1072 = vsyncpa [#allocation4], 1 }
 0x1e3   :  { %1074 = vsyncpa [#allocation4 + $0x1], 1 }

</bundles_post_ra>
